<compile_context>
chip_gen: v7x
topology: tpu7x:2x2x1
jax: 0.10.0
libtpu: 0.0.40
codegen_flags: <defaults>
</compile_context>

<pallas_src>
import functools

import jax
import jax.numpy as jnp
from jax import lax
from jax.experimental import pallas as pl
from jax.experimental.pallas import tpu as pltpu


def _round_up(x, m):
    return (x + m - 1) // m * m


def _eia_conv3x3_relu_kernel(x_ref, s_ref, w_ref, b_ref, o_ref, xe_ref, taps_ref,
                             *, H, W, pad_left):
    """Fused: fold eia scale into weights -> 3x3 conv (pad=1) -> + bias -> ReLU.

    x_ref   : (B, C_in, H*W)        flattened NCHW images (lane axis = H*W)
    s_ref   : (B, 1, 9*C_in)        eia scale, pre-tiled along the stacked-tap K axis
    w_ref   : (C_out, 9*C_in)       conv_se weight, K index = (kh*3+kw)*C_in + cin
    b_ref   : (C_out, 1)            conv_se bias
    o_ref   : (B, C_out, H*W)
    xe_ref  : (C_in, pad_left + H*W + W + 1)  zero-haloed, UNscaled image scratch
    taps_ref: (9*C_in, H*W)         stacked (im2col) taps scratch
    """
    HW = H * W
    B, C_in = x_ref.shape[0], x_ref.shape[1]

    # Halo invariant: zero the scratch exactly once.  The interior
    # [pad_left, pad_left + HW) is fully overwritten for every image below and the
    # halos are NEVER written anywhere else, so they stay zero for all later images
    # and grid steps.  (Do not add writes outside the interior without re-zeroing.)
    @pl.when(pl.program_id(0) == 0)
    def _():
        xe_ref[...] = jnp.zeros_like(xe_ref)

    # Column masks for the +-1 horizontal taps (row out-of-range taps read the zero
    # halo).  Built & broadcast once, reused for all 6 masked taps of all B images.
    col = lax.broadcasted_iota(jnp.int32, (C_in, HW), 1) % W
    mask_l = (col >= 1).astype(jnp.float32)        # pixel (h, w-1) exists
    mask_r = (col < (W - 1)).astype(jnp.float32)   # pixel (h, w+1) exists

    bias = b_ref[...]                              # (C_out, 1)

    for bi in range(B):
        # Fold the per-channel eia scale into the weights (9*C_out*C_in multiplies)
        # instead of scaling the C_in*HW image.
        w_scaled = w_ref[...] * s_ref[bi]          # (C_out, 9*C_in)

        # Lane-aligned store of the unscaled image into the haloed scratch interior
        # (pad_left is a multiple of 128 -> unmasked, aligned vst).
        xe_ref[:, pl.ds(pad_left, HW)] = x_ref[bi].astype(jnp.float32)

        # im2col: stack the 9 shifted taps along the contraction (sublane) axis.
        k = 0
        for dh in (-1, 0, 1):
            for dw in (-1, 0, 1):
                tap = xe_ref[:, pl.ds(pad_left + dh * W + dw, HW)]   # static slice
                if dw == -1:
                    tap = tap * mask_l
                elif dw == 1:
                    tap = tap * mask_r
                taps_ref[pl.ds(k * C_in, C_in), :] = tap
                k += 1

        # ONE MXU matmul per image with K = 9*C_in (MXU accumulates internally).
        acc = jnp.dot(w_scaled, taps_ref[...], preferred_element_type=jnp.float32)
        o_ref[bi] = jnp.maximum(acc + bias, 0.0).astype(o_ref.dtype)


def _vmem_capacity_bytes():
    # Generation-aware VMEM budget (v5e/v6e: 128 MiB, v7x: 64 MiB per TensorCore).
    try:
        cap = getattr(pltpu.get_tpu_info(), "vmem_capacity_bytes", None)
        if cap:
            return int(cap)
    except Exception:
        pass
    return 64 * (1 << 20)      # conservative fallback (v7x per-TC)


def _pick_block_batch(n, per_image_block_bytes, budget_bytes):
    best = 1
    for b in range(1, min(n, 8) + 1):
        if n % b == 0 and b * per_image_block_bytes <= budget_bytes:
            best = b
    return best


def eia_conv_se_relu(feats, scale, conv_w, conv_b):
    """relu(conv3x3_pad1(feats * scale[..., None, None]) + bias); NCHW in/out."""
    N, C_in, H, W = feats.shape
    C_out = conv_w.shape[0]
    HW = H * W
    pad_left = _round_up(W + 1, 128)       # aligned interior store into the halo buffer
    xe_w = pad_left + HW + (W + 1)

    x_flat = feats.reshape(N, C_in, HW)                        # free row-major reshape
    # eia scale tiled to match the stacked-tap K axis: s_tiled[n, k*C_in + c] = scale[n, c]
    s_tiled = jnp.tile(scale, (1, 9)).reshape(N, 1, 9 * C_in)
    # OIHW -> (C_out, kh, kw, C_in) -> (C_out, 9*C_in); K index = (kh*3+kw)*C_in + cin
    w_flat = jnp.transpose(conv_w, (0, 2, 3, 1)).reshape(C_out, 9 * C_in)
    b2 = conv_b.reshape(C_out, 1)

    vmem_cap = _vmem_capacity_bytes()
    per_img = 2 * 4 * (C_in + C_out) * HW                      # double-buffered in/out
    fixed = 4 * (C_in * xe_w + 9 * C_in * HW
                 + 2 * (C_out * 9 * C_in + 9 * C_in + C_out))  # scratch + small operands
    B = _pick_block_batch(N, per_img, max(per_img, min(8 << 20, vmem_cap // 8)))

    kernel = functools.partial(_eia_conv3x3_relu_kernel, H=H, W=W, pad_left=pad_left)

    cost = pl.CostEstimate(
        flops=2 * N * HW * 9 * C_in * C_out,
        transcendentals=0,
        bytes_accessed=4 * (N * C_in * HW + N * C_out * HW
                            + 9 * C_out * C_in + C_out + N * 9 * C_in),
    )

    cp_kwargs = dict(dimension_semantics=("parallel",))
    est = B * per_img + fixed
    if est > 12 * (1 << 20):
        # TODO(synk): for very large C_in*H*W (v7x: 64 MiB VMEM) add a row-halo spatial
        # grid axis / C_out tiling instead of only raising the scoped-VMEM limit.
        cp_kwargs["vmem_limit_bytes"] = int(min(est * 5 // 4, vmem_cap * 9 // 10))

    out_flat = pl.pallas_call(
        kernel,
        out_shape=jax.ShapeDtypeStruct((N, C_out, HW), feats.dtype),
        grid_spec=pltpu.PrefetchScalarGridSpec(
            num_scalar_prefetch=0,
            grid=(N // B,),
            in_specs=[
                pl.BlockSpec((B, C_in, HW), lambda n: (n, 0, 0)),
                pl.BlockSpec((B, 1, 9 * C_in), lambda n: (n, 0, 0)),
                pl.BlockSpec((C_out, 9 * C_in), lambda n: (0, 0)),
                pl.BlockSpec((C_out, 1), lambda n: (0, 0)),
            ],
            out_specs=pl.BlockSpec((B, C_out, HW), lambda n: (n, 0, 0)),
            scratch_shapes=[
                pltpu.VMEM((C_in, xe_w), jnp.float32),        # zero-haloed image
                pltpu.VMEM((9 * C_in, HW), jnp.float32),      # stacked im2col taps
            ],
        ),
        compiler_params=pltpu.CompilerParams(**cp_kwargs),
        cost_estimate=cost,
    )(x_flat, s_tiled, w_flat, b2)

    return out_flat.reshape(N, C_out, H, W)


def upsample_nearest_2x(x):
    # F.interpolate(x, scale_factor=2, mode="nearest"): out[h, w] = in[h // 2, w // 2]
    return jnp.repeat(jnp.repeat(x, 2, axis=2), 2, axis=3)


def eia_scale(feats, conv1d_w):
    # eia_layer: AdaptiveAvgPool2d(1) -> Conv1d(1,1,k, pad=(k-1)//2, bias=False) over the
    # channel axis -> sigmoid.  Returns (N, C) attention weights.
    m = feats.mean(axis=(2, 3))                     # (N, C)
    k = conv1d_w.shape[0]
    p = (k - 1) // 2
    mp = jnp.pad(m, ((0, 0), (p, p)))
    C = m.shape[1]
    y = sum(conv1d_w[j] * mp[:, j:j + C] for j in range(k))
    return jax.nn.sigmoid(y)


# TODO(synk): upsample / concat / eia global-pool+conv1d are cheap O(N*C*H*W) JAX glue
# outside the kernel; the 3x3 conv path dominates HBM traffic and is the fused kernel.
def attention_module_forward(high_features, low_features, params):
    feats = jnp.concatenate(
        [upsample_nearest_2x(high_features)] + list(low_features), axis=1)
    scale = eia_scale(feats, params["eia_conv1d_w"])
    return eia_conv_se_relu(feats, scale, params["conv_se_w"], params["conv_se_b"])


def attention_module_reference(high_features, low_features, params):
    feats = jnp.concatenate(
        [upsample_nearest_2x(high_features)] + list(low_features), axis=1)
    scale = eia_scale(feats, params["eia_conv1d_w"])
    x = feats * scale[:, :, None, None]
    y = lax.conv_general_dilated(
        x, params["conv_se_w"], window_strides=(1, 1), padding="SAME",
        dimension_numbers=("NCHW", "OIHW", "NCHW"),
        precision=lax.Precision.HIGHEST)
    return jnp.maximum(y + params["conv_se_b"][None, :, None, None], 0.0)


if __name__ == "__main__":
    key = jax.random.PRNGKey(0)
    k1, k2, k3, k4, k5 = jax.random.split(key, 5)

    N = 2
    c_high, c_low = 8, 8              # in_channel = 16, out_channel = c_high = 8
    H, W = 16, 16                     # low-feature spatial size; high is H//2 x W//2
    c_in, c_out = c_high + c_low, c_high

    high_features = jax.random.normal(k1, (N, c_high, H // 2, W // 2), jnp.float32)
    low_features = [jax.random.normal(k2, (N, c_low, H, W), jnp.float32)]

    params = {
        "eia_conv1d_w": 0.3 * jax.random.normal(k3, (5,), jnp.float32),
        "conv_se_w": jax.random.normal(k4, (c_out, c_in, 3, 3), jnp.float32)
        / jnp.sqrt(jnp.float32(c_in * 9)),
        "conv_se_b": 0.1 * jax.random.normal(k5, (c_out,), jnp.float32),
    }

    fwd = jax.jit(attention_module_forward)
    y = fwd(high_features, low_features, params)
    jax.block_until_ready(y)

    y_ref = attention_module_reference(high_features, low_features, params)
    assert y.shape == (N, c_out, H, W), y.shape
    max_err = float(jnp.max(jnp.abs(y - y_ref)))
    assert jnp.allclose(y, y_ref, atol=1e-3, rtol=1e-3), max_err

    print("KERNEL_OK")
</pallas_src>

<mosaic_0001>
module attributes {stable_mosaic.version = 11 : i64} {
  func.func @_eia_conv3x3_relu_kernel(%arg0: i32, %arg1: memref<2x16x256xf32, #tpu.memory_space<vmem>>, %arg2: memref<2x1x144xf32, #tpu.memory_space<vmem>>, %arg3: memref<8x144xf32, #tpu.memory_space<vmem>>, %arg4: memref<8x1xf32, #tpu.memory_space<vmem>>, %arg5: memref<2x8x256xf32, #tpu.memory_space<vmem>>, %arg6: memref<16x401xf32, #tpu.memory_space<vmem>>, %arg7: memref<144x256xf32, #tpu.memory_space<vmem>>) attributes {dimension_semantics = [#tpu.dimension_semantics<parallel>], iteration_bounds = array<i64: 1>, scalar_prefetch = 0 : i64, scratch_operands = 2 : i64, tpu.core_type = #tpu.core_type<tc>, window_params = [{transform_indices = @transform_0, window_bounds = array<i64: 2, 16, 256>}, {transform_indices = @transform_1, window_bounds = array<i64: 2, 1, 144>}, {pipeline_mode = #tpu.pipeline_mode<synchronous>, transform_indices = @transform_2, window_bounds = array<i64: 8, 144>}, {pipeline_mode = #tpu.pipeline_mode<synchronous>, transform_indices = @transform_3, window_bounds = array<i64: 8, 1>}, {transform_indices = @transform_4, window_bounds = array<i64: 2, 8, 256>}]} {
    %c0_i32 = arith.constant 0 : i32
    %0 = arith.cmpi eq, %arg0, %c0_i32 : i32
    %1 = arith.extui %0 : i1 to i32
    %c0_i32_0 = arith.constant 0 : i32
    %2 = arith.cmpi ne, %1, %c0_i32_0 : i32
    scf.if %2 {
      %cst_96 = arith.constant 0.000000e+00 : f32
      %111 = vector.broadcast %cst_96 : f32 to vector<16x401xf32>
      %c0_97 = arith.constant 0 : index
      %c0_98 = arith.constant 0 : index
      %112 = vector.load %arg6[%c0_97, %c0_98] : memref<16x401xf32, #tpu.memory_space<vmem>>, vector<16x401xf32>
      tpu.vector_store %arg6[%c0_97, %c0_98], %111 {strides = array<i32>} : memref<16x401xf32, #tpu.memory_space<vmem>>, vector<16x401xf32>,
    } else {
    }
    %3 = tpu.iota {dimensions = array<i32: 1>} : vector<16x256xi32>
    %c16_i32 = arith.constant 16 : i32
    %c0_i32_1 = arith.constant 0 : i32
    %4 = arith.cmpi eq, %c16_i32, %c0_i32_1 : i32
    %c1_i32 = arith.constant 1 : i32
    %5 = arith.select %4, %c1_i32, %c16_i32 : i32
    %6 = vector.broadcast %5 : i32 to vector<16x256xi32>
    %7 = arith.remsi %3, %6 : vector<16x256xi32>
    %c0_i32_2 = arith.constant 0 : i32
    %8 = vector.broadcast %c0_i32_2 : i32 to vector<16x256xi32>
    %9 = arith.cmpi ne, %7, %8 : vector<16x256xi32>
    %c0_i32_3 = arith.constant 0 : i32
    %10 = vector.broadcast %c0_i32_3 : i32 to vector<16x256xi32>
    %11 = arith.cmpi slt, %7, %10 : vector<16x256xi32>
    %c0_i32_4 = arith.constant 0 : i32
    %12 = arith.cmpi slt, %5, %c0_i32_4 : i32
    %13 = vector.broadcast %12 : i1 to vector<16x256xi1>
    %14 = vector.broadcast %13 : vector<16x256xi1> to vector<16x256xi1>
    %15 = arith.xori %11, %14 : vector<16x256xi1>
    %16 = arith.andi %15, %9 : vector<16x256xi1>
    %17 = vector.broadcast %5 : i32 to vector<16x256xi32>
    %18 = arith.addi %7, %17 : vector<16x256xi32>
    %19 = arith.select %16, %18, %7 : vector<16x256xi1>, vector<16x256xi32>
    %c1_i32_5 = arith.constant 1 : i32
    %20 = vector.broadcast %c1_i32_5 : i32 to vector<16x256xi32>
    %21 = arith.cmpi sge, %19, %20 : vector<16x256xi32>
    %22 = arith.extui %21 : vector<16x256xi1> to vector<16x256xi32>
    %23 = arith.sitofp %22 : vector<16x256xi32> to vector<16x256xf32>
    %c15_i32 = arith.constant 15 : i32
    %24 = vector.broadcast %c15_i32 : i32 to vector<16x256xi32>
    %25 = arith.cmpi slt, %19, %24 : vector<16x256xi32>
    %26 = arith.extui %25 : vector<16x256xi1> to vector<16x256xi32>
    %27 = arith.sitofp %26 : vector<16x256xi32> to vector<16x256xf32>
    %c0 = arith.constant 0 : index
    %c0_6 = arith.constant 0 : index
    %28 = vector.load %arg4[%c0, %c0_6] : memref<8x1xf32, #tpu.memory_space<vmem>>, vector<8x1xf32>
    %c0_7 = arith.constant 0 : index
    %c0_8 = arith.constant 0 : index
    %29 = vector.load %arg3[%c0_7, %c0_8] : memref<8x144xf32, #tpu.memory_space<vmem>>, vector<8x144xf32>
    %c0_9 = arith.constant 0 : index
    %c0_10 = arith.constant 0 : index
    %c0_11 = arith.constant 0 : index
    %30 = vector.load %arg2[%c0_9, %c0_10, %c0_11] : memref<2x1x144xf32, #tpu.memory_space<vmem>>, vector<1x1x144xf32>
    %31 = vector.shape_cast %30 : vector<1x1x144xf32> to vector<1x144xf32>
    %32 = vector.broadcast %31 : vector<1x144xf32> to vector<8x144xf32>
    %33 = arith.mulf %29, %32 : vector<8x144xf32>
    %c0_12 = arith.constant 0 : index
    %c0_13 = arith.constant 0 : index
    %c0_14 = arith.constant 0 : index
    %34 = vector.load %arg1[%c0_12, %c0_13, %c0_14] : memref<2x16x256xf32, #tpu.memory_space<vmem>>, vector<1x16x256xf32>
    %35 = vector.shape_cast %34 : vector<1x16x256xf32> to vector<16x256xf32>
    %c0_15 = arith.constant 0 : index
    %c128 = arith.constant 128 : index
    %36 = vector.load %arg6[%c0_15, %c128] : memref<16x401xf32, #tpu.memory_space<vmem>>, vector<16x256xf32>
    tpu.vector_store %arg6[%c0_15, %c128], %35 {strides = array<i32>} : memref<16x401xf32, #tpu.memory_space<vmem>>, vector<16x256xf32>,
    %c0_16 = arith.constant 0 : index
    %c111 = arith.constant 111 : index
    %37 = vector.load %arg6[%c0_16, %c111] : memref<16x401xf32, #tpu.memory_space<vmem>>, vector<16x256xf32>
    %38 = arith.mulf %37, %23 : vector<16x256xf32>
    %c0_17 = arith.constant 0 : index
    %c0_18 = arith.constant 0 : index
    %39 = vector.load %arg7[%c0_17, %c0_18] : memref<144x256xf32, #tpu.memory_space<vmem>>, vector<16x256xf32>
    tpu.vector_store %arg7[%c0_17, %c0_18], %38 {strides = array<i32>} : memref<144x256xf32, #tpu.memory_space<vmem>>, vector<16x256xf32>,
    %c0_19 = arith.constant 0 : index
    %c112 = arith.constant 112 : index
    %40 = vector.load %arg6[%c0_19, %c112] : memref<16x401xf32, #tpu.memory_space<vmem>>, vector<16x256xf32>
    %c16 = arith.constant 16 : index
    %c0_20 = arith.constant 0 : index
    %41 = vector.load %arg7[%c16, %c0_20] : memref<144x256xf32, #tpu.memory_space<vmem>>, vector<16x256xf32>
    tpu.vector_store %arg7[%c16, %c0_20], %40 {strides = array<i32>} : memref<144x256xf32, #tpu.memory_space<vmem>>, vector<16x256xf32>,
    %c0_21 = arith.constant 0 : index
    %c113 = arith.constant 113 : index
    %42 = vector.load %arg6[%c0_21, %c113] : memref<16x401xf32, #tpu.memory_space<vmem>>, vector<16x256xf32>
    %43 = arith.mulf %42, %27 : vector<16x256xf32>
    %c32 = arith.constant 32 : index
    %c0_22 = arith.constant 0 : index
    %44 = vector.load %arg7[%c32, %c0_22] : memref<144x256xf32, #tpu.memory_space<vmem>>, vector<16x256xf32>
    tpu.vector_store %arg7[%c32, %c0_22], %43 {strides = array<i32>} : memref<144x256xf32, #tpu.memory_space<vmem>>, vector<16x256xf32>,
    %c0_23 = arith.constant 0 : index
    %c127 = arith.constant 127 : index
    %45 = vector.load %arg6[%c0_23, %c127] : memref<16x401xf32, #tpu.memory_space<vmem>>, vector<16x256xf32>
    %46 = arith.mulf %45, %23 : vector<16x256xf32>
    %c48 = arith.constant 48 : index
    %c0_24 = arith.constant 0 : index
    %47 = vector.load %arg7[%c48, %c0_24] : memref<144x256xf32, #tpu.memory_space<vmem>>, vector<16x256xf32>
    tpu.vector_store %arg7[%c48, %c0_24], %46 {strides = array<i32>} : memref<144x256xf32, #tpu.memory_space<vmem>>, vector<16x256xf32>,
    %c0_25 = arith.constant 0 : index
    %c128_26 = arith.constant 128 : index
    %48 = vector.load %arg6[%c0_25, %c128_26] : memref<16x401xf32, #tpu.memory_space<vmem>>, vector<16x256xf32>
    %c64 = arith.constant 64 : index
    %c0_27 = arith.constant 0 : index
    %49 = vector.load %arg7[%c64, %c0_27] : memref<144x256xf32, #tpu.memory_space<vmem>>, vector<16x256xf32>
    tpu.vector_store %arg7[%c64, %c0_27], %48 {strides = array<i32>} : memref<144x256xf32, #tpu.memory_space<vmem>>, vector<16x256xf32>,
    %c0_28 = arith.constant 0 : index
    %c129 = arith.constant 129 : index
    %50 = vector.load %arg6[%c0_28, %c129] : memref<16x401xf32, #tpu.memory_space<vmem>>, vector<16x256xf32>
    %51 = arith.mulf %50, %27 : vector<16x256xf32>
    %c80 = arith.constant 80 : index
    %c0_29 = arith.constant 0 : index
    %52 = vector.load %arg7[%c80, %c0_29] : memref<144x256xf32, #tpu.memory_space<vmem>>, vector<16x256xf32>
    tpu.vector_store %arg7[%c80, %c0_29], %51 {strides = array<i32>} : memref<144x256xf32, #tpu.memory_space<vmem>>, vector<16x256xf32>,
    %c0_30 = arith.constant 0 : index
    %c143 = arith.constant 143 : index
    %53 = vector.load %arg6[%c0_30, %c143] : memref<16x401xf32, #tpu.memory_space<vmem>>, vector<16x256xf32>
    %54 = arith.mulf %53, %23 : vector<16x256xf32>
    %c96 = arith.constant 96 : index
    %c0_31 = arith.constant 0 : index
    %55 = vector.load %arg7[%c96, %c0_31] : memref<144x256xf32, #tpu.memory_space<vmem>>, vector<16x256xf32>
    tpu.vector_store %arg7[%c96, %c0_31], %54 {strides = array<i32>} : memref<144x256xf32, #tpu.memory_space<vmem>>, vector<16x256xf32>,
    %c0_32 = arith.constant 0 : index
    %c144 = arith.constant 144 : index
    %56 = vector.load %arg6[%c0_32, %c144] : memref<16x401xf32, #tpu.memory_space<vmem>>, vector<16x256xf32>
    %c112_33 = arith.constant 112 : index
    %c0_34 = arith.constant 0 : index
    %57 = vector.load %arg7[%c112_33, %c0_34] : memref<144x256xf32, #tpu.memory_space<vmem>>, vector<16x256xf32>
    tpu.vector_store %arg7[%c112_33, %c0_34], %56 {strides = array<i32>} : memref<144x256xf32, #tpu.memory_space<vmem>>, vector<16x256xf32>,
    %c0_35 = arith.constant 0 : index
    %c145 = arith.constant 145 : index
    %58 = vector.load %arg6[%c0_35, %c145] : memref<16x401xf32, #tpu.memory_space<vmem>>, vector<16x256xf32>
    %59 = arith.mulf %58, %27 : vector<16x256xf32>
    %c128_36 = arith.constant 128 : index
    %c0_37 = arith.constant 0 : index
    %60 = vector.load %arg7[%c128_36, %c0_37] : memref<144x256xf32, #tpu.memory_space<vmem>>, vector<16x256xf32>
    tpu.vector_store %arg7[%c128_36, %c0_37], %59 {strides = array<i32>} : memref<144x256xf32, #tpu.memory_space<vmem>>, vector<16x256xf32>,
    %c0_38 = arith.constant 0 : index
    %c0_39 = arith.constant 0 : index
    %61 = vector.load %arg7[%c0_38, %c0_39] : memref<144x256xf32, #tpu.memory_space<vmem>>, vector<144x256xf32>
    %cst = arith.constant dense<0.000000e+00> : vector<8x256xf32>
    %62 = tpu.matmul %33, %61, %cst {dimension_numbers = #tpu.dot_dimension_numbers<[1], [0], [0], [1], [0, 0, 1, 1], [], []>} : vector<8x144xf32>, vector<144x256xf32>, vector<8x256xf32> -> vector<8x256xf32>
    %63 = vector.broadcast %28 : vector<8x1xf32> to vector<8x256xf32>
    %64 = arith.addf %62, %63 : vector<8x256xf32>
    %cst_40 = arith.constant 0.000000e+00 : f32
    %65 = vector.broadcast %cst_40 : f32 to vector<8x256xf32>
    %66 = arith.maximumf %64, %65 : vector<8x256xf32>
    %c0_41 = arith.constant 0 : index
    %c0_42 = arith.constant 0 : index
    %c0_43 = arith.constant 0 : index
    %67 = vector.load %arg5[%c0_41, %c0_42, %c0_43] : memref<2x8x256xf32, #tpu.memory_space<vmem>>, vector<1x8x256xf32>
    %68 = vector.shape_cast %67 : vector<1x8x256xf32> to vector<8x256xf32>
    %69 = vector.shape_cast %66 : vector<8x256xf32> to vector<1x8x256xf32>
    tpu.vector_store %arg5[%c0_41, %c0_42, %c0_43], %69 {strides = array<i32>} : memref<2x8x256xf32, #tpu.memory_space<vmem>>, vector<1x8x256xf32>,
    %c0_44 = arith.constant 0 : index
    %c0_45 = arith.constant 0 : index
    %70 = vector.load %arg3[%c0_44, %c0_45] : memref<8x144xf32, #tpu.memory_space<vmem>>, vector<8x144xf32>
    %c1 = arith.constant 1 : index
    %c0_46 = arith.constant 0 : index
    %c0_47 = arith.constant 0 : index
    %71 = vector.load %arg2[%c1, %c0_46, %c0_47] : memref<2x1x144xf32, #tpu.memory_space<vmem>>, vector<1x1x144xf32>
    %72 = vector.shape_cast %71 : vector<1x1x144xf32> to vector<1x144xf32>
    %73 = vector.broadcast %72 : vector<1x144xf32> to vector<8x144xf32>
    %74 = arith.mulf %70, %73 : vector<8x144xf32>
    %c1_48 = arith.constant 1 : index
    %c0_49 = arith.constant 0 : index
    %c0_50 = arith.constant 0 : index
    %75 = vector.load %arg1[%c1_48, %c0_49, %c0_50] : memref<2x16x256xf32, #tpu.memory_space<vmem>>, vector<1x16x256xf32>
    %76 = vector.shape_cast %75 : vector<1x16x256xf32> to vector<16x256xf32>
    %c0_51 = arith.constant 0 : index
    %c128_52 = arith.constant 128 : index
    %77 = vector.load %arg6[%c0_51, %c128_52] : memref<16x401xf32, #tpu.memory_space<vmem>>, vector<16x256xf32>
    tpu.vector_store %arg6[%c0_51, %c128_52], %76 {strides = array<i32>} : memref<16x401xf32, #tpu.memory_space<vmem>>, vector<16x256xf32>,
    %c0_53 = arith.constant 0 : index
    %c111_54 = arith.constant 111 : index
    %78 = vector.load %arg6[%c0_53, %c111_54] : memref<16x401xf32, #tpu.memory_space<vmem>>, vector<16x256xf32>
    %79 = arith.mulf %78, %23 : vector<16x256xf32>
    %c0_55 = arith.constant 0 : index
    %c0_56 = arith.constant 0 : index
    %80 = vector.load %arg7[%c0_55, %c0_56] : memref<144x256xf32, #tpu.memory_space<vmem>>, vector<16x256xf32>
    tpu.vector_store %arg7[%c0_55, %c0_56], %79 {strides = array<i32>} : memref<144x256xf32, #tpu.memory_space<vmem>>, vector<16x256xf32>,
    %c0_57 = arith.constant 0 : index
    %c112_58 = arith.constant 112 : index
    %81 = vector.load %arg6[%c0_57, %c112_58] : memref<16x401xf32, #tpu.memory_space<vmem>>, vector<16x256xf32>
    %c16_59 = arith.constant 16 : index
    %c0_60 = arith.constant 0 : index
    %82 = vector.load %arg7[%c16_59, %c0_60] : memref<144x256xf32, #tpu.memory_space<vmem>>, vector<16x256xf32>
    tpu.vector_store %arg7[%c16_59, %c0_60], %81 {strides = array<i32>} : memref<144x256xf32, #tpu.memory_space<vmem>>, vector<16x256xf32>,
    %c0_61 = arith.constant 0 : index
    %c113_62 = arith.constant 113 : index
    %83 = vector.load %arg6[%c0_61, %c113_62] : memref<16x401xf32, #tpu.memory_space<vmem>>, vector<16x256xf32>
    %84 = arith.mulf %83, %27 : vector<16x256xf32>
    %c32_63 = arith.constant 32 : index
    %c0_64 = arith.constant 0 : index
    %85 = vector.load %arg7[%c32_63, %c0_64] : memref<144x256xf32, #tpu.memory_space<vmem>>, vector<16x256xf32>
    tpu.vector_store %arg7[%c32_63, %c0_64], %84 {strides = array<i32>} : memref<144x256xf32, #tpu.memory_space<vmem>>, vector<16x256xf32>,
    %c0_65 = arith.constant 0 : index
    %c127_66 = arith.constant 127 : index
    %86 = vector.load %arg6[%c0_65, %c127_66] : memref<16x401xf32, #tpu.memory_space<vmem>>, vector<16x256xf32>
    %87 = arith.mulf %86, %23 : vector<16x256xf32>
    %c48_67 = arith.constant 48 : index
    %c0_68 = arith.constant 0 : index
    %88 = vector.load %arg7[%c48_67, %c0_68] : memref<144x256xf32, #tpu.memory_space<vmem>>, vector<16x256xf32>
    tpu.vector_store %arg7[%c48_67, %c0_68], %87 {strides = array<i32>} : memref<144x256xf32, #tpu.memory_space<vmem>>, vector<16x256xf32>,
    %c0_69 = arith.constant 0 : index
    %c128_70 = arith.constant 128 : index
    %89 = vector.load %arg6[%c0_69, %c128_70] : memref<16x401xf32, #tpu.memory_space<vmem>>, vector<16x256xf32>
    %c64_71 = arith.constant 64 : index
    %c0_72 = arith.constant 0 : index
    %90 = vector.load %arg7[%c64_71, %c0_72] : memref<144x256xf32, #tpu.memory_space<vmem>>, vector<16x256xf32>
    tpu.vector_store %arg7[%c64_71, %c0_72], %89 {strides = array<i32>} : memref<144x256xf32, #tpu.memory_space<vmem>>, vector<16x256xf32>,
    %c0_73 = arith.constant 0 : index
    %c129_74 = arith.constant 129 : index
    %91 = vector.load %arg6[%c0_73, %c129_74] : memref<16x401xf32, #tpu.memory_space<vmem>>, vector<16x256xf32>
    %92 = arith.mulf %91, %27 : vector<16x256xf32>
    %c80_75 = arith.constant 80 : index
    %c0_76 = arith.constant 0 : index
    %93 = vector.load %arg7[%c80_75, %c0_76] : memref<144x256xf32, #tpu.memory_space<vmem>>, vector<16x256xf32>
    tpu.vector_store %arg7[%c80_75, %c0_76], %92 {strides = array<i32>} : memref<144x256xf32, #tpu.memory_space<vmem>>, vector<16x256xf32>,
    %c0_77 = arith.constant 0 : index
    %c143_78 = arith.constant 143 : index
    %94 = vector.load %arg6[%c0_77, %c143_78] : memref<16x401xf32, #tpu.memory_space<vmem>>, vector<16x256xf32>
    %95 = arith.mulf %94, %23 : vector<16x256xf32>
    %c96_79 = arith.constant 96 : index
    %c0_80 = arith.constant 0 : index
    %96 = vector.load %arg7[%c96_79, %c0_80] : memref<144x256xf32, #tpu.memory_space<vmem>>, vector<16x256xf32>
    tpu.vector_store %arg7[%c96_79, %c0_80], %95 {strides = array<i32>} : memref<144x256xf32, #tpu.memory_space<vmem>>, vector<16x256xf32>,
    %c0_81 = arith.constant 0 : index
    %c144_82 = arith.constant 144 : index
    %97 = vector.load %arg6[%c0_81, %c144_82] : memref<16x401xf32, #tpu.memory_space<vmem>>, vector<16x256xf32>
    %c112_83 = arith.constant 112 : index
    %c0_84 = arith.constant 0 : index
    %98 = vector.load %arg7[%c112_83, %c0_84] : memref<144x256xf32, #tpu.memory_space<vmem>>, vector<16x256xf32>
    tpu.vector_store %arg7[%c112_83, %c0_84], %97 {strides = array<i32>} : memref<144x256xf32, #tpu.memory_space<vmem>>, vector<16x256xf32>,
    %c0_85 = arith.constant 0 : index
    %c145_86 = arith.constant 145 : index
    %99 = vector.load %arg6[%c0_85, %c145_86] : memref<16x401xf32, #tpu.memory_space<vmem>>, vector<16x256xf32>
    %100 = arith.mulf %99, %27 : vector<16x256xf32>
    %c128_87 = arith.constant 128 : index
    %c0_88 = arith.constant 0 : index
    %101 = vector.load %arg7[%c128_87, %c0_88] : memref<144x256xf32, #tpu.memory_space<vmem>>, vector<16x256xf32>
    tpu.vector_store %arg7[%c128_87, %c0_88], %100 {strides = array<i32>} : memref<144x256xf32, #tpu.memory_space<vmem>>, vector<16x256xf32>,
    %c0_89 = arith.constant 0 : index
    %c0_90 = arith.constant 0 : index
    %102 = vector.load %arg7[%c0_89, %c0_90] : memref<144x256xf32, #tpu.memory_space<vmem>>, vector<144x256xf32>
    %cst_91 = arith.constant dense<0.000000e+00> : vector<8x256xf32>
    %103 = tpu.matmul %74, %102, %cst_91 {dimension_numbers = #tpu.dot_dimension_numbers<[1], [0], [0], [1], [0, 0, 1, 1], [], []>} : vector<8x144xf32>, vector<144x256xf32>, vector<8x256xf32> -> vector<8x256xf32>
    %104 = vector.broadcast %28 : vector<8x1xf32> to vector<8x256xf32>
    %105 = arith.addf %103, %104 : vector<8x256xf32>
    %cst_92 = arith.constant 0.000000e+00 : f32
    %106 = vector.broadcast %cst_92 : f32 to vector<8x256xf32>
    %107 = arith.maximumf %105, %106 : vector<8x256xf32>
    %c1_93 = arith.constant 1 : index
    %c0_94 = arith.constant 0 : index
    %c0_95 = arith.constant 0 : index
    %108 = vector.load %arg5[%c1_93, %c0_94, %c0_95] : memref<2x8x256xf32, #tpu.memory_space<vmem>>, vector<1x8x256xf32>
    %109 = vector.shape_cast %108 : vector<1x8x256xf32> to vector<8x256xf32>
    %110 = vector.shape_cast %107 : vector<8x256xf32> to vector<1x8x256xf32>
    tpu.vector_store %arg5[%c1_93, %c0_94, %c0_95], %110 {strides = array<i32>} : memref<2x8x256xf32, #tpu.memory_space<vmem>>, vector<1x8x256xf32>,
    return
  }
  func.func @transform_0(%arg0: i32) -> (i32, i32, i32) {
    %c0_i32 = arith.constant 0 : i32
    %c0_i32_0 = arith.constant 0 : i32
    %c0_i32_1 = arith.constant 0 : i32
    return %arg0, %c0_i32, %c0_i32_0 : i32, i32, i32
  }
  func.func @transform_1(%arg0: i32) -> (i32, i32, i32) {
    %c0_i32 = arith.constant 0 : i32
    %c0_i32_0 = arith.constant 0 : i32
    %c0_i32_1 = arith.constant 0 : i32
    return %arg0, %c0_i32, %c0_i32_0 : i32, i32, i32
  }
  func.func @transform_2(%arg0: i32) -> (i32, i32) {
    %c0_i32 = arith.constant 0 : i32
    %c0_i32_0 = arith.constant 0 : i32
    %c0_i32_1 = arith.constant 0 : i32
    return %c0_i32, %c0_i32_0 : i32, i32
  }
  func.func @transform_3(%arg0: i32) -> (i32, i32) {
    %c0_i32 = arith.constant 0 : i32
    %c0_i32_0 = arith.constant 0 : i32
    %c0_i32_1 = arith.constant 0 : i32
    return %c0_i32, %c0_i32_0 : i32, i32
  }
  func.func @transform_4(%arg0: i32) -> (i32, i32, i32) {
    %c0_i32 = arith.constant 0 : i32
    %c0_i32_0 = arith.constant 0 : i32
    %c0_i32_1 = arith.constant 0 : i32
    return %arg0, %c0_i32, %c0_i32_0 : i32, i32, i32
  }
}

</mosaic_0001>

<bundles_post_ra>
// kernel: attention_module_forward.1
= control target key start
LH: loop header
LB: loop body
LE: loop exit
PB: predicated region body
PF: predicated region fallthrough
CT: control target
= control target key end

     0   :  { %v30_v0 = vlaneseq  ;;  %vm24_vm0 = vcmask 138240   ;;  %v1448_v2 = vmov 0.0   ;;  %s1449_s23 = smov 111   ;;  %s1450_s24 = smov 127   ;;  %vm106_vm5 = vcmask 908288   ;;  %s1894_s0 = inlined_call_operand.vmem [shape: f32[2,16,256], index: 0, kind: input, shape index: {}]   ;;  %s1895_s1 = inlined_call_operand.vmem [shape: f32[2,1,144], index: 1, kind: input, shape index: {}]   ;;  %s1896_s2 = inlined_call_operand.vmem [shape: f32[8,144], index: 2, kind: input, shape index: {}]   ;;  %s1897_s3 = inlined_call_operand.vmem [shape: f32[8,1], index: 3, kind: input, shape index: {}]   ;;  %s1898_s4 = inlined_call_operand.vmem [shape: f32[2,8,256], index: 4, kind: output, shape index: {}]  }
   0x1   :  { %v1486_v1 = vld [vmem:[%s1894_s0 + $0x20] sm:$0xff]  ;;  %25 = vst.msk [vmem:[#allocation2 + $0x18] sm:$0xff] %vm24_vm0, %v1448_v2  ;;  %29 = vst.msk [vmem:[#allocation2 + $0x38] sm:$0xff] %vm24_vm0, %v1448_v2  ;;  %v1494_v4 = vld [vmem:[%s1894_s0 + $0x28] sm:$0xff]  ;;  %s1451_s25 = smov 113   ;;  %s1452_s26 = smov 1  }
   0x2   :  { %v31_v3 = vand.u32 127, %v30_v0  ;;  %v1499_v5 = vld [vmem:[%s1894_s0 + $0x30] sm:$0xff]  ;;  %v1504_v6 = vld [vmem:[%s1894_s0 + $0x38] sm:$0xff]  ;;  %v1513_v16 = vld [vmem:[%s1894_s0] sm:$0xff]  ;;  %s1453_s9 = smov 15   ;;  %s1454_s10 = smov 17   ;;  %v1217_v22 = vpack.i.bf16 %v1494_v4, %v1486_v1 }
   0x3   :  { %v1518_v17 = vld [vmem:[%s1894_s0 + $0x8] sm:$0xff]  ;;  %v1523_v18 = vld [vmem:[%s1894_s0 + $0x10] sm:$0xff]  ;;  %v1528_v19 = vld [vmem:[%s1894_s0 + $0x18] sm:$0xff]  ;;  %s1455_s11 = smov 16   ;;  %v1227_v23 = vpack.i.bf16 %v1504_v6, %v1499_v5  ;;  %s1456_s0 = smov 112   ;;  %v1262_v31 = vpack.i.bf16 %v1499_v5, %v1486_v1  ;;  %vm197_vm6 = vcmask 924672  }
   0x4   :  { %v32_v7 = vadd.s32 128, %v31_v3  ;;  %v37_v8 = vand.u32 15, %v31_v3  ;;  %v1207_v20 = vpack.i.bf16 %v1518_v17, %v1513_v16  ;;  %v1212_v21 = vpack.i.bf16 %v1528_v19, %v1523_v18 }
   0x5   :  { %v1257_v30 = vpack.i.bf16 %v1523_v18, %v1513_v16  ;;  %vm249_vm7 = vcmask 1039360   ;;  %vm278_vm8 = vcmask 7168   ;;  %vm423_vm9 = vcmask 916480  }
   0x6   :  { %v44_v9 = vand.u32 15, %v32_v7  ;;  %vm57_vm1 = vcmp.ge.s32.totalorder %v37_v8, 1  ;;  %vm63_vm2 = vcmp.lt.s32.totalorder %v37_v8, 15  ;;  %vm226_vm10 = vcmask 121856  }
   0x7   :  { %v1082_v10 = vsel %vm57_vm1, 1.0, %v1448_v2  ;;  %v1084_v12 = vsel %vm63_vm2, 1.0, %v1448_v2  ;;  %vm172_vm11 = vcmask 130048  }
   0x8   :  { %vm58_vm3 = vcmp.ge.s32.totalorder %v44_v9, 1  ;;  %vm64_vm4 = vcmp.lt.s32.totalorder %v44_v9, 15  ;;  %v1540_v24 = vld [vmem:[#allocation2 + $0x18] sm:$0xff] }
   0x9   :  { %v1083_v11 = vsel %vm58_vm3, 1.0, %v1448_v2  ;;  %v1085_v13 = vsel %vm64_vm4, 1.0, %v1448_v2  ;;  %v1542_v25 = vld [vmem:[#allocation2 + $0x38] sm:$0xff]  ;;  %v1237_v26 = vpack.i.bf16 %v1540_v24, %v1518_v17  ;;  %v1247_v28 = vpack.i.bf16 %v1540_v24, %v1494_v4 }
   0xa   :  { %v1177_v14 = vpack.i.bf16 %v1083_v11, %v1082_v10  ;;  %v1182_v15 = vpack.i.bf16 %v1085_v13, %v1084_v12  ;;  %v1242_v27 = vpack.i.bf16 %v1542_v25, %v1528_v19  ;;  %v1252_v29 = vpack.i.bf16 %v1542_v25, %v1504_v6 }
   0xc   :  { %1178 = vrot.lane.b32.xlu0 %v1177_v14, %s1449_s23  ;;  %1188 = vrot.lane.b32.xlu1 %v1177_v14, %s1450_s24 }
  0x10   :  { %1183 = vrot.lane.b32.xlu0 %v1182_v15, %s1451_s25  ;;  %1193 = vrot.lane.b32.xlu1 %v1182_v15, %s1452_s26 }
  0x14   :  { %1198 = vrot.lane.b32.xlu0 %v1177_v14, %s1453_s9  ;;  %1203 = vrot.lane.b32.xlu1 %v1182_v15, %s1454_s10 }
  0x18   :  { %1208 = vrot.lane.b32.xlu0 %v1207_v20, %s1455_s11  ;;  %1213 = vrot.lane.b32.xlu1 %v1212_v21, %s1455_s11 }
  0x1c   :  { %1218 = vrot.lane.b32.xlu0 %v1217_v22, %s1455_s11  ;;  %1228 = vrot.lane.b32.xlu1 %v1227_v23, %s1455_s11 }
  0x20   :  { %1223 = vrot.lane.b32.xlu0 %v1448_v2, %s1455_s11  ;;  %1233 = vrot.lane.b32.xlu1 %v1448_v2, %s1455_s11 }
  0x24   :  { %1238 = vrot.lane.b32.xlu0 %v1237_v26, %s1456_s0  ;;  %1243 = vrot.lane.b32.xlu1 %v1242_v27, %s1456_s0 }
  0x28   :  { %1248 = vrot.lane.b32.xlu0 %v1247_v28, %s1456_s0  ;;  %1253 = vrot.lane.b32.xlu1 %v1252_v29, %s1456_s0 }
  0x2c   :  { %1258 = vrot.lane.b32.xlu0 %v1257_v30, %s1456_s0  ;;  %1263 = vrot.lane.b32.xlu1 %v1262_v31, %s1456_s0 }
  0x7e   :  { %v1179_v32 = vpop.permute.xlu0 %1178  ;;  %v1556_v33 = vpop.permute.xlu1 %1188 }
  0x7f   :  { %v1180_v34 = vunpack.i.l.bf16 %v1179_v32  ;;  %v1190_v35 = vunpack.i.l.bf16 %v1556_v33  ;;  %v1181_v55 = vunpack.i.h.bf16 %v1179_v32  ;;  %v1191_v30 = vunpack.i.h.bf16 %v1556_v33 }
  0x81   :  { %v637_v36 = vmul.f32 0.0, %v1180_v34  ;;  %v757_v42 = vmul.f32 0.0, %v1190_v35  ;;  %v107_v2 = vsel %vm106_vm5, %v1180_v34, %v1181_v55  ;;  %v116_v11 = vmul.f32 %v1181_v55, %v1528_v19 }
  0x82   :  { %v1184_v37 = vpop.permute.xlu0 %1183  ;;  %v1559_v38 = vpop.permute.xlu1 %1193  ;;  %v115_v10 = vmul.f32 %v107_v2, %v1523_v18  ;;  %v112_v12 = vmul.f32 %v107_v2, %v1513_v16  ;;  %v113_v13 = vmul.f32 %v1181_v55, %v1518_v17  ;;  %v641_v15 = vmul.f32 %v1499_v5, %v107_v2 }
  0x83   :  { %v1185_v39 = vunpack.i.l.bf16 %v1184_v37  ;;  %v1272_v40 = vpack.i.bf16 %v637_v36, %v637_v36  ;;  %v1562_v41 = vunpack.i.l.bf16 %v1559_v38  ;;  %v1292_v52 = vpack.i.bf16 %v757_v42, %v757_v42 }
  0x84   :  { %v1186_v14 = vunpack.i.h.bf16 %v1184_v37  ;;  %v642_v20 = vmul.f32 %v1181_v55, %v1504_v6  ;;  %v1322_v22 = vpack.i.bf16 %v116_v11, %v115_v10  ;;  %v1317_v23 = vpack.i.bf16 %v113_v13, %v112_v12 }
  0x85   :  { %1273 = vrot.lane.b32.xlu1 %v1272_v40, %s1454_s10  ;;  %1268 = vrot.lane.b32.xlu0 %v1272_v40, %s1454_s10  ;;  %v715_v43 = vmul.f32 0.0, %v1185_v39  ;;  %v807_v47 = vmul.f32 %v1562_v41, %v1486_v1  ;;  %v810_v49 = vmul.f32 %v1562_v41, %v1499_v5  ;;  %v313_v50 = vmul.f32 %v1562_v41, %v1513_v16 }
  0x86   :  { %v1568_v44 = vpop.permute.xlu0 %1198  ;;  %v1570_v45 = vpop.permute.xlu1 %1203  ;;  %v316_v51 = vmul.f32 %v1562_v41, %v1523_v18  ;;  %v638_v26 = vmul.f32 %v1486_v1, %v107_v2  ;;  %v639_v27 = vmul.f32 %v1181_v55, %v1494_v4  ;;  %v198_v29 = vsel %vm197_vm6, %v1185_v39, %v1186_v14 }
  0x87   :  { %v1282_v46 = vpack.i.bf16 %v715_v43, %v715_v43  ;;  %v1575_v48 = vunpack.i.l.bf16 %v1568_v44  ;;  %v1302_v56 = vpack.i.bf16 %v810_v49, %v807_v47  ;;  %v1332_v31 = vpack.i.bf16 %v642_v20, %v641_v15 }
  0x88   :  { %v1297_v57 = vpack.i.bf16 %v316_v51, %v313_v50  ;;  %v207_v32 = vmul.f32 %v1186_v14, %v1528_v19  ;;  %v1327_v34 = vpack.i.bf16 %v639_v27, %v638_v26  ;;  %v206_v36 = vmul.f32 %v198_v29, %v1523_v18 }
  0x89   :  { %1283 = vrot.lane.b32.xlu1 %v1282_v46, %s1453_s9  ;;  %1278 = vrot.lane.b32.xlu0 %v1282_v46, %s1453_s9  ;;  %v849_v58 = vmul.f32 %v1575_v48, %v1486_v1  ;;  %v852_v59 = vmul.f32 %v1575_v48, %v1499_v5  ;;  %v363_v60 = vmul.f32 %v1575_v48, %v1513_v16  ;;  %v1196_v51 = vunpack.i.h.bf16 %v1559_v38 }
  0x8a   :  { %v1585_v53 = vpop.permute.xlu0 %1208  ;;  %v1587_v54 = vpop.permute.xlu1 %1213  ;;  %v366_v61 = vmul.f32 %v1575_v48, %v1523_v18  ;;  %v203_v37 = vmul.f32 %v198_v29, %v1513_v16  ;;  %v204_v40 = vmul.f32 %v1186_v14, %v1518_v17  ;;  %v719_v39 = vmul.f32 %v1499_v5, %v198_v29 }
  0x8b   :  { %v1312_v3 = vpack.i.bf16 %v852_v59, %v849_v58  ;;  %v720_v46 = vmul.f32 %v1186_v14, %v1504_v6  ;;  %v716_v47 = vmul.f32 %v1486_v1, %v198_v29  ;;  %v717_v49 = vmul.f32 %v1186_v14, %v1494_v4 }
  0x8c   :  { %v1307_v7 = vpack.i.bf16 %v366_v61, %v363_v60  ;;  %v250_v50 = vsel %vm249_vm7, %v1190_v35, %v1191_v30  ;;  %v1337_v55 = vpack.i.bf16 %v204_v40, %v203_v37  ;;  %v256_v59 = vmul.f32 %v1191_v30, %v1518_v17 }
  0x8d   :  { %1293 = vrot.lane.b32.xlu1 %v1292_v52, %s1452_s26  ;;  %1288 = vrot.lane.b32.xlu0 %v1292_v52, %s1452_s26  ;;  %v1342_v52 = vpack.i.bf16 %v207_v32, %v206_v36  ;;  %v255_v58 = vmul.f32 %v250_v50, %v1513_v16  ;;  %v1352_v35 = vpack.i.bf16 %v720_v46, %v719_v39 }
  0x8e   :  { %v1599_v62 = vpop.permute.xlu0 %1218  ;;  %v1601_v63 = vpop.permute.xlu1 %1228  ;;  %v1347_v60 = vpack.i.bf16 %v717_v49, %v716_v47  ;;  %v761_v38 = vmul.f32 %v1499_v5, %v250_v50  ;;  %v762_v61 = vmul.f32 %v1191_v30, %v1504_v6  ;;  %v758_v2 = vmul.f32 %v1486_v1, %v250_v50 }
  0x8f   :  { %v759_v32 = vmul.f32 %v1191_v30, %v1494_v4 }
  0x91   :  { %1303 = vrot.lane.b32.xlu1 %v1302_v56, %s1450_s24  ;;  %1298 = vrot.lane.b32.xlu0 %v1297_v57, %s1450_s24  ;;  %v259_v56 = vmul.f32 %v1191_v30, %v1528_v19  ;;  %v258_v57 = vmul.f32 %v250_v50, %v1523_v18 }
  0x92   :  { %v1606_v8 = vpop.permute.xlu0 %1223  ;;  %v1608_v9 = vpop.permute.xlu1 %1233 }
  0x93   :  { %v1362_v20 = vpack.i.bf16 %v259_v56, %v258_v57 }
  0x95   :  { %1313 = vrot.lane.b32.xlu1 %v1312_v3, %s1451_s25  ;;  %1308 = vrot.lane.b32.xlu0 %v1307_v7, %s1451_s25  ;;  %v309_v3 = vsel %vm278_vm8, %v1562_v41, %v1196_v51 }
  0x96   :  { %v1618_v21 = vpop.permute.xlu0 %1238  ;;  %v1622_v28 = vpop.permute.xlu1 %1243  ;;  %v314_v30 = vmul.f32 %v309_v3, %v1518_v17 }
  0x97   :  { %v1241_v7 = vunpack.i.h.bf16 %v1618_v21  ;;  %v1240_v10 = vunpack.i.l.bf16 %v1618_v21  ;;  %v1246_v12 = vunpack.i.h.bf16 %v1622_v28  ;;  %v1245_v13 = vunpack.i.l.bf16 %v1622_v28 }
  0x98   :  { %v1372_v21 = vpack.i.bf16 %v762_v61, %v761_v38  ;;  %v318_v28 = vmul.f32 %v1196_v51, %v1542_v25  ;;  %v1205_v38 = vunpack.i.l.bf16 %v1570_v45 }
  0x99   :  { %1323 = vrot.lane.b32.xlu1 %v1322_v22, %s1454_s10  ;;  %1318 = vrot.lane.b32.xlu0 %v1317_v23, %s1454_s10  ;;  %v1357_v22 = vpack.i.bf16 %v256_v59, %v255_v58  ;;  %v1663_v36 = vsel %vm423_vm9, %v1240_v10, %v1241_v7  ;;  %v1666_v37 = vsel %vm423_vm9, %v1245_v13, %v1246_v12  ;;  %v1201_v58 = vunpack.i.h.bf16 %v1568_v44 }
  0x9a   :  { %v1249_v42 = vpop.permute.xlu0 %1248  ;;  %v1254_v43 = vpop.permute.xlu1 %1253  ;;  %v1123_v39 = vpack.c.bf16 %v1666_v37, %v1663_v36  ;;  %v811_v59 = vmul.f32 %v1504_v6, %v309_v3  ;;  %v1206_v44 = vunpack.i.h.bf16 %v1570_v45 }
  0x9b   :  { %v1251_v23 = vunpack.i.h.bf16 %v1249_v42  ;;  %v1250_v26 = vunpack.i.l.bf16 %v1249_v42  ;;  %v1256_v41 = vunpack.i.h.bf16 %v1254_v43  ;;  %v1255_v27 = vunpack.i.l.bf16 %v1254_v43 }
  0x9c   :  { %v1392_v61 = vpack.i.bf16 %v318_v28, %v811_v59 }
  0x9d   :  { %1333 = vrot.lane.b32.xlu1 %v1332_v31, %s1454_s10  ;;  %1328 = vrot.lane.b32.xlu0 %v1327_v34, %s1454_s10  ;;  %v317_v34 = vmul.f32 %v309_v3, %v1528_v19  ;;  %v1682_v46 = vsel %vm423_vm9, %v1250_v26, %v1251_v23  ;;  %v1685_v47 = vsel %vm423_vm9, %v1255_v27, %v1256_v41 }
  0x9e   :  { %v1259_v33 = vpop.permute.xlu0 %1258  ;;  %v1264_v11 = vpop.permute.xlu1 %1263  ;;  %v1159_v56 = vpack.c.bf16 %v1685_v47, %v1682_v46  ;;  %v452_v23 = vmul.f32 %v1206_v44, %v1540_v24 }
  0x9f   :  { %v1261_v14 = vunpack.i.h.bf16 %v1259_v33  ;;  %v1260_v15 = vunpack.i.l.bf16 %v1259_v33  ;;  %v1266_v29 = vunpack.i.h.bf16 %v1264_v11  ;;  %v1265_v31 = vunpack.i.l.bf16 %v1264_v11 }
  0xa0   :  { %v1382_v33 = vpack.i.bf16 %v318_v28, %v317_v34  ;;  %v927_v34 = vmul.f32 %v1205_v38, %v1486_v1  ;;  %v930_v28 = vmul.f32 %v1205_v38, %v1499_v5 }
  0xa1   :  { %1343 = vrot.lane.b32.xlu1 %v1342_v52, %s1453_s9  ;;  %1338 = vrot.lane.b32.xlu0 %v1337_v55, %s1453_s9  ;;  %v1669_v40 = vsel %vm423_vm9, %v1260_v15, %v1240_v10  ;;  %v1672_v42 = vsel %vm423_vm9, %v1261_v14, %v1245_v13  ;;  %v1688_v49 = vsel %vm423_vm9, %v1265_v31, %v1250_v26 }
  0xa2   :  { %v1125_v43 = vpack.c.bf16 %v1672_v42, %v1669_v40  ;;  %v1691_v50 = vsel %vm423_vm9, %v1266_v29, %v1255_v27  ;;  %v1367_v52 = vpack.i.bf16 %v759_v32, %v758_v2  ;;  %v315_v55 = vmul.f32 %v1196_v51, %v1540_v24 }
  0xa3   :  { %v1161_v57 = vpack.c.bf16 %v1691_v50, %v1688_v49  ;;  %v359_v51 = vsel %vm226_vm10, %v1575_v48, %v1201_v58  ;;  %v368_v2 = vmul.f32 %v1201_v58, %v1542_v25  ;;  %v446_v48 = vsel %vm24_vm0, %v1205_v38, %v1206_v44 }
  0xa4   :  { %v367_v10 = vmul.f32 %v359_v51, %v1528_v19  ;;  %v364_v11 = vmul.f32 %v359_v51, %v1518_v17  ;;  %v853_v12 = vmul.f32 %v1504_v6, %v359_v51  ;;  %v850_v14 = vmul.f32 %v1494_v4, %v359_v51 }
  0xa5   :  { %1353 = vrot.lane.b32.xlu1 %v1352_v35, %s1453_s9  ;;  %1348 = vrot.lane.b32.xlu0 %v1347_v60, %s1453_s9  ;;  %v1377_v35 = vpack.i.bf16 %v315_v55, %v314_v30  ;;  %v808_v60 = vmul.f32 %v1494_v4, %v309_v3  ;;  %v365_v3 = vmul.f32 %v1201_v58, %v1540_v24  ;;  %v72_v30 = vld [vmem:[%s1895_s1] sm:$0x3] }
  0xa6   :  { %v1402_v13 = vpack.i.bf16 %v368_v2, %v367_v10  ;;  %v454_v15 = vmul.f32 %v446_v48, %v1528_v19  ;;  %v1412_v26 = vpack.i.bf16 %v368_v2, %v853_v12  ;;  %v931_v31 = vmul.f32 %v1504_v6, %v446_v48  ;;  %v69_v12 = vld [vmem:[%s1897_s3] sm:$0xff] }
  0xa7   :  { %v1387_v7 = vpack.i.bf16 %v315_v55, %v808_v60  ;;  %v1397_v45 = vpack.i.bf16 %v365_v3, %v364_v11  ;;  %v1407_v41 = vpack.i.bf16 %v365_v3, %v850_v14  ;;  %v450_v55 = vmul.f32 %v1205_v38, %v1513_v16 }
  0xa8   :  { %v453_v58 = vmul.f32 %v1205_v38, %v1523_v18  ;;  %v1457_v38 = vmov 0  }
  0xa9   :  { %1363 = vrot.lane.b32.xlu1 %v1362_v20, %s1452_s26  ;;  %1358 = vrot.lane.b32.xlu0 %v1357_v22, %s1452_s26  ;;  %v455_v20 = vmul.f32 %v1206_v44, %v1542_v25  ;;  %v451_v22 = vmul.f32 %v446_v48, %v1518_v17  ;;  %v75_v25 = vshrl.u32 %v30_v0, 7 }
  0xaa   :  { %1447 = vset.pattern.permute.xlu0 %v1457_v38 }
  0xab   :  { %v1422_v27 = vpack.i.bf16 %v455_v20, %v454_v15  ;;  %v1417_v29 = vpack.i.bf16 %v452_v23, %v451_v22  ;;  %v1437_v32 = vpack.i.bf16 %v455_v20, %v931_v31  ;;  %v76_v59 = vsub.s32 0, %v75_v25 }
  0xac   :  { %v80_v0 = vsub.s32 1, %v75_v25  ;;  %v1215_v31 = vunpack.i.l.bf16 %v1587_v54 }
  0xad   :  { %1373 = vrot.lane.b32.xlu1 %v1372_v21, %s1452_s26  ;;  %1368 = vrot.lane.b32.xlu0 %v1367_v52, %s1452_s26  ;;  %v928_v21 = vmul.f32 %v1494_v4, %v446_v48  ;;  %v1087_v52 = vld [vmem:[%s1895_s1 + $0x2] sm:$0x3]  ;;  %v77_v60 = vrot.slane %v72_v30, %v76_v59 }
  0xae   :  { %v81_v51 = vrot.slane %v72_v30, %v80_v0  ;;  %v613_v44 = vrot.slane %v1087_v52, %v76_v59  ;;  %v617_v2 = vrot.slane %v1087_v52, %v80_v0  ;;  %v1231_v30 = vunpack.i.h.bf16 %v1601_v63 }
  0xaf   :  { %v1427_v24 = vpack.i.bf16 %v452_v23, %v928_v21 }
  0xb1   :  { %1383 = vrot.lane.b32.xlu1 %v1382_v33, %s1450_s24  ;;  %1378 = vrot.lane.b32.xlu0 %v1377_v35, %s1450_s24  ;;  %v71_v33 = vld [vmem:[%s1896_s2 + $0x8] sm:$0xff]  ;;  %v70_v35 = vld [vmem:[%s1896_s2] sm:$0xff] }
  0xb2   :  { %v85_v10 = vmul.f32 %v81_v51, %v71_v33  ;;  %v1749_v11 = vmul.f32 %v77_v60, %v70_v35  ;;  %v1751_v3 = vmul.f32 %v613_v44, %v70_v35  ;;  %v621_v48 = vmul.f32 %v617_v2, %v71_v33 }
  0xb4   :  { %1086 = vmatprep.mubr.msk.f32.mxu0 %vm172_vm11, %v85_v10  ;;  %1092 = vmatprep.mubr.msk.f32.mxu1 %vm172_vm11, %v621_v48 }
  0xb5   :  { %1393 = vrot.lane.b32.xlu1 %v1392_v61, %s1450_s24  ;;  %1388 = vrot.lane.b32.xlu0 %v1387_v7, %s1450_s24  ;;  %v1442_v61 = vpack.i.bf16 %v930_v28, %v927_v34  ;;  %v1432_v7 = vpack.i.bf16 %v453_v58, %v450_v55  ;;  %v1225_v34 = vunpack.i.l.bf16 %v1606_v8  ;;  %v1220_v28 = vunpack.i.l.bf16 %v1599_v62 }
  0xb6   :  { %v1236_v55 = vunpack.i.h.bf16 %v1608_v9 }
  0xb9   :  { %1403 = vrot.lane.b32.xlu1 %v1402_v13, %s1451_s25  ;;  %1398 = vrot.lane.b32.xlu0 %v1397_v45, %s1451_s25 }
  0xbd   :  { %1413 = vrot.lane.b32.xlu1 %v1412_v26, %s1451_s25  ;;  %1408 = vrot.lane.b32.xlu0 %v1407_v41, %s1451_s25  ;;  %v1211_v41 = vunpack.i.h.bf16 %v1585_v53 }
  0xc1   :  { %1423 = vrot.lane.b32.xlu1 %v1422_v27, %s1449_s23  ;;  %1418 = vrot.lane.b32.xlu0 %v1417_v29, %s1449_s23  ;;  %v1210_v27 = vunpack.i.l.bf16 %v1585_v53  ;;  %v1216_v29 = vunpack.i.h.bf16 %v1587_v54  ;;  %v1230_v54 = vunpack.i.l.bf16 %v1601_v63 }
  0xc3   :  { %v174_v53 = vsel %vm172_vm11, %v1210_v27, %v1211_v41  ;;  %v176_v52 = vsel %vm172_vm11, %v1215_v31, %v1216_v29 }
  0xc4   :  { %v1099_v44 = vpack.c.bf16 %v176_v52, %v174_v53 }
  0xc5   :  { %1438 = vrot.lane.b32.xlu1 %v1437_v32, %s1449_s23  ;;  %1428 = vrot.lane.b32.xlu0 %v1427_v24, %s1449_s23  ;;  %v1221_v32 = vunpack.i.h.bf16 %v1599_v62  ;;  %v1226_v24 = vunpack.i.h.bf16 %v1606_v8  ;;  %v1235_v62 = vunpack.i.l.bf16 %v1608_v9 }
  0xc7   :  { %v175_v2 = vsel %vm172_vm11, %v1226_v24, %v1215_v31  ;;  %v698_v31 = vsel %vm172_vm11, %v1220_v28, %v1221_v32  ;;  %v700_v24 = vsel %vm172_vm11, %v1230_v54, %v1231_v30 }
  0xc9   :  { %1443 = vrot.lane.b32.xlu1 %v1442_v61, %s1449_s23  ;;  %1433 = vrot.lane.b32.xlu0 %v1432_v7, %s1449_s23  ;;  %v173_v61 = vsel %vm172_vm11, %v1225_v34, %v1210_v27  ;;  %v697_v34 = vsel %vm172_vm11, %v1235_v62, %v1220_v28 }
  0xca   :  { %v1101_v30 = vpack.c.bf16 %v175_v2, %v173_v61 }
  0xcd   :  { %524 = vperm.xlu0 %1447, %v69_v12  }
  0xf7   :  { %v1274_v13 = vpop.permute.xlu1 %1273  ;;  %v1269_v45 = vpop.permute.xlu0 %1268 }
  0xf8   :  { %v1271_v58 = vunpack.i.h.bf16 %v1269_v45  ;;  %v1270_v59 = vunpack.i.l.bf16 %v1269_v45  ;;  %v1276_v48 = vunpack.i.h.bf16 %v1274_v13  ;;  %v1275_v12 = vunpack.i.l.bf16 %v1274_v13 }
  0xfb   :  { %v1760_v14 = vpop.permute.xlu1 %1283  ;;  %v1762_v15 = vpop.permute.xlu0 %1278 }
  0xfc   :  { %v1286_v61 = vunpack.i.h.bf16 %v1760_v14  ;;  %v1285_v2 = vunpack.i.l.bf16 %v1760_v14 }
  0xff   :  { %v1764_v20 = vpop.permute.xlu1 %1293  ;;  %v1766_v22 = vpop.permute.xlu0 %1288 }
 0x103   :  { %v1768_v23 = vpop.permute.xlu1 %1303  ;;  %v1770_v26 = vpop.permute.xlu0 %1298 }
 0x107   :  { %v1776_v21 = vpop.permute.xlu1 %1313  ;;  %v1778_v25 = vpop.permute.xlu0 %1308 }
 0x10b   :  { %v1324_v0 = vpop.permute.xlu1 %1323  ;;  %v1319_v33 = vpop.permute.xlu0 %1318 }
 0x10c   :  { %v1326_v35 = vunpack.i.h.bf16 %v1324_v0  ;;  %v1325_v60 = vunpack.i.l.bf16 %v1324_v0  ;;  %v1321_v51 = vunpack.i.h.bf16 %v1319_v33  ;;  %v1320_v8 = vunpack.i.l.bf16 %v1319_v33 }
 0x10e   :  { %v137_v38 = vsel %vm24_vm0, %v1320_v8, %v1321_v51  ;;  %v139_v63 = vsel %vm24_vm0, %v1325_v60, %v1326_v35  ;;  %v136_v7 = vsel %vm24_vm0, %v1270_v59, %v1320_v8  ;;  %v138_v10 = vsel %vm24_vm0, %v1271_v58, %v1325_v60 }
 0x10f   :  { %v1334_v45 = vpop.permute.xlu1 %1333  ;;  %v1329_v41 = vpop.permute.xlu0 %1328  ;;  %v1095_v29 = vpack.c.bf16 %v139_v63, %v137_v38  ;;  %v1097_v0 = vpack.c.bf16 %v138_v10, %v136_v7  ;;  %v699_v59 = vsel %vm172_vm11, %v1236_v55, %v1230_v54  ;;  %v1280_v60 = vunpack.i.l.bf16 %v1762_v15 }
 0x110   :  { %v1336_v9 = vunpack.i.h.bf16 %v1334_v45  ;;  %v1335_v53 = vunpack.i.l.bf16 %v1334_v45  ;;  %v1331_v52 = vunpack.i.h.bf16 %v1329_v41  ;;  %v1330_v27 = vunpack.i.l.bf16 %v1329_v41 }
 0x111   :  { %1096 = vmatprep.subr.bf16.mxu0 %v1095_v29  ;;  %v1281_v63 = vunpack.i.h.bf16 %v1762_v15  ;;  %v1135_v7 = vpack.c.bf16 %v700_v24, %v698_v31  ;;  %v1137_v10 = vpack.c.bf16 %v699_v59, %v697_v34  ;;  %v1291_v59 = vunpack.i.h.bf16 %v1766_v22 }
 0x112   :  { %1098 = vmatpush1.bf16.msra.mxu0 %v1097_v0  ;;  %v662_v13 = vsel %vm24_vm0, %v1330_v27, %v1331_v52  ;;  %v664_v58 = vsel %vm24_vm0, %v1335_v53, %v1336_v9  ;;  %v661_v33 = vsel %vm24_vm0, %v1275_v12, %v1330_v27  ;;  %v663_v35 = vsel %vm24_vm0, %v1276_v48, %v1335_v53 }
 0x113   :  { %v1344_v51 = vpop.permute.xlu1 %1343  ;;  %v1339_v8 = vpop.permute.xlu0 %1338  ;;  %1100 = vmatprep.subr.bf16.mxu0 %v1099_v44  ;;  %v1131_v32 = vpack.c.bf16 %v664_v58, %v662_v13  ;;  %v1133_v38 = vpack.c.bf16 %v663_v35, %v661_v33  ;;  %v1290_v13 = vunpack.i.l.bf16 %v1766_v22 }
 0x114   :  { %v1346_v28 = vunpack.i.h.bf16 %v1344_v51  ;;  %v1345_v62 = vunpack.i.l.bf16 %v1344_v51  ;;  %v1341_v54 = vunpack.i.h.bf16 %v1339_v8  ;;  %v1340_v55 = vunpack.i.l.bf16 %v1339_v8 }
 0x115   :  { %1132 = vmatprep.subr.bf16.mxu1 %v1131_v32 }
 0x116   :  { %1102 = vmatpush1.bf16.msra.mxu0 %v1101_v30  ;;  %1134 = vmatpush1.bf16.msra.mxu1 %v1133_v38  ;;  %v228_v48 = vsel %vm226_vm10, %v1340_v55, %v1341_v54  ;;  %v230_v12 = vsel %vm226_vm10, %v1345_v62, %v1346_v28  ;;  %v227_v44 = vsel %vm226_vm10, %v1280_v60, %v1340_v55  ;;  %v1296_v55 = vunpack.i.h.bf16 %v1764_v20 }
 0x117   :  { %v1354_v45 = vpop.permute.xlu1 %1353  ;;  %v1349_v41 = vpop.permute.xlu0 %1348  ;;  %1136 = vmatprep.subr.bf16.mxu1 %v1135_v7  ;;  %v1103_v29 = vpack.c.bf16 %v230_v12, %v228_v48  ;;  %v229_v15 = vsel %vm226_vm10, %v1281_v63, %v1345_v62  ;;  %v1111_v38 = vpack.c.bf16 %v1528_v19, %v1518_v17  ;;  %v1295_v63 = vunpack.i.l.bf16 %v1764_v20 }
 0x118   :  { %v1356_v0 = vunpack.i.h.bf16 %v1354_v45  ;;  %v1355_v9 = vunpack.i.l.bf16 %v1354_v45  ;;  %v1351_v53 = vunpack.i.h.bf16 %v1349_v41  ;;  %v1350_v52 = vunpack.i.l.bf16 %v1349_v41 }
 0x119   :  { %1104 = vmatprep.subr.bf16.mxu0 %v1103_v29  ;;  %v1105_v27 = vpack.c.bf16 %v229_v15, %v227_v44  ;;  %v1300_v15 = vunpack.i.l.bf16 %v1770_v26 }
 0x11a   :  { %1138 = vmatpush1.bf16.msra.mxu1 %v1137_v10  ;;  %v740_v31 = vsel %vm226_vm10, %v1350_v52, %v1351_v53  ;;  %v742_v24 = vsel %vm226_vm10, %v1355_v9, %v1356_v0  ;;  %v739_v34 = vsel %vm226_vm10, %v1285_v2, %v1350_v52  ;;  %v741_v14 = vsel %vm226_vm10, %v1286_v61, %v1355_v9 }
 0x11b   :  { %1106 = vmatpush1.bf16.msra.mxu0 %v1105_v27  ;;  %v1364_v58 = vpop.permute.xlu1 %1363  ;;  %v1359_v33 = vpop.permute.xlu0 %1358  ;;  %v1139_v35 = vpack.c.bf16 %v742_v24, %v740_v31  ;;  %v1141_v60 = vpack.c.bf16 %v741_v14, %v739_v34  ;;  %v1113_v2 = vpack.c.bf16 %v1523_v18, %v1513_v16  ;;  %v1147_v27 = vpack.c.bf16 %v1504_v6, %v1494_v4 }
 0x11c   :  { %v1366_v51 = vunpack.i.h.bf16 %v1364_v58  ;;  %v1365_v8 = vunpack.i.l.bf16 %v1364_v58  ;;  %v1361_v32 = vunpack.i.h.bf16 %v1359_v33  ;;  %v1360_v30 = vunpack.i.l.bf16 %v1359_v33 }
 0x11d   :  { %1140 = vmatprep.subr.bf16.mxu1 %v1139_v35  ;;  %v1301_v34 = vunpack.i.h.bf16 %v1770_v26  ;;  %v1149_v14 = vpack.c.bf16 %v1499_v5, %v1486_v1  ;;  %v1306_v4 = vunpack.i.h.bf16 %v1768_v23  ;;  %v1305_v6 = vunpack.i.l.bf16 %v1768_v23 }
 0x11e   :  { %1142 = vmatpush1.bf16.msra.mxu1 %v1141_v60  ;;  %v280_v28 = vsel %vm278_vm8, %v1360_v30, %v1361_v32  ;;  %v282_v62 = vsel %vm278_vm8, %v1365_v8, %v1366_v51  ;;  %v279_v22 = vsel %vm278_vm8, %v1290_v13, %v1360_v30  ;;  %v281_v54 = vsel %vm278_vm8, %v1291_v59, %v1365_v8 }
 0x11f   :  { %v1374_v7 = vpop.permute.xlu1 %1373  ;;  %v1369_v10 = vpop.permute.xlu0 %1368  ;;  %v1107_v48 = vpack.c.bf16 %v282_v62, %v280_v28  ;;  %v1109_v12 = vpack.c.bf16 %v281_v54, %v279_v22  ;;  %v1311_v62 = vunpack.i.h.bf16 %v1778_v25  ;;  %v1310_v22 = vunpack.i.l.bf16 %v1778_v25 }
 0x120   :  { %v1376_v44 = vunpack.i.h.bf16 %v1374_v7  ;;  %v1375_v61 = vunpack.i.l.bf16 %v1374_v7  ;;  %v1371_v17 = vunpack.i.h.bf16 %v1369_v10  ;;  %v1370_v19 = vunpack.i.l.bf16 %v1369_v10 }
 0x121   :  { %1108 = vmatprep.subr.bf16.mxu0 %v1107_v48  ;;  %v1316_v25 = vunpack.i.h.bf16 %v1776_v21 }
 0x122   :  { %1110 = vmatpush1.bf16.msra.mxu0 %v1109_v12  ;;  %v782_v45 = vsel %vm278_vm8, %v1370_v19, %v1371_v17  ;;  %v784_v41 = vsel %vm278_vm8, %v1375_v61, %v1376_v44  ;;  %v781_v29 = vsel %vm278_vm8, %v1295_v63, %v1370_v19  ;;  %v783_v20 = vsel %vm278_vm8, %v1296_v55, %v1375_v61 }
 0x123   :  { %v1384_v0 = vpop.permute.xlu1 %1383  ;;  %v1379_v9 = vpop.permute.xlu0 %1378  ;;  %1112 = vmatprep.subr.bf16.mxu0 %v1111_v38  ;;  %v1143_v53 = vpack.c.bf16 %v784_v41, %v782_v45  ;;  %v1145_v52 = vpack.c.bf16 %v783_v20, %v781_v29  ;;  %v1315_v45 = vunpack.i.l.bf16 %v1776_v21 }
 0x124   :  { %v1386_v16 = vunpack.i.h.bf16 %v1384_v0  ;;  %v1385_v18 = vunpack.i.l.bf16 %v1384_v0  ;;  %v1381_v31 = vunpack.i.h.bf16 %v1379_v9  ;;  %v1380_v24 = vunpack.i.l.bf16 %v1379_v9 }
 0x125   :  { %1144 = vmatprep.subr.bf16.mxu1 %v1143_v53 }
 0x126   :  { %1114 = vmatpush1.bf16.msra.mxu0 %v1113_v2  ;;  %1146 = vmatpush1.bf16.msra.mxu1 %v1145_v52  ;;  %v338_v59 = vsel %vm249_vm7, %v1380_v24, %v1381_v31  ;;  %v340_v13 = vsel %vm249_vm7, %v1385_v18, %v1386_v16  ;;  %v337_v58 = vsel %vm249_vm7, %v1300_v15, %v1380_v24 }
 0x127   :  { %v1394_v33 = vpop.permute.xlu1 %1393  ;;  %v1389_v35 = vpop.permute.xlu0 %1388  ;;  %v1115_v60 = vpack.c.bf16 %v340_v13, %v338_v59  ;;  %1148 = vmatprep.subr.bf16.mxu1 %v1147_v27  ;;  %v339_v26 = vsel %vm249_vm7, %v1301_v34, %v1385_v18 }
 0x128   :  { %v1396_v51 = vunpack.i.h.bf16 %v1394_v33  ;;  %v1395_v1 = vunpack.i.l.bf16 %v1394_v33  ;;  %v1391_v5 = vunpack.i.h.bf16 %v1389_v35  ;;  %v1390_v8 = vunpack.i.l.bf16 %v1389_v35 }
 0x129   :  { %1116 = vmatprep.subr.bf16.mxu0 %v1115_v60  ;;  %v1117_v32 = vpack.c.bf16 %v339_v26, %v337_v58 }
 0x12a   :  { %1150 = vmatpush1.bf16.msra.mxu1 %v1149_v14  ;;  %v832_v30 = vsel %vm249_vm7, %v1390_v8, %v1391_v5  ;;  %v834_v38 = vsel %vm249_vm7, %v1395_v1, %v1396_v51  ;;  %v831_v28 = vsel %vm249_vm7, %v1305_v6, %v1390_v8  ;;  %v833_v23 = vsel %vm249_vm7, %v1306_v4, %v1395_v1 }
 0x12b   :  { %1118 = vmatpush1.bf16.msra.mxu0 %v1117_v32  ;;  %v1404_v54 = vpop.permute.xlu1 %1403  ;;  %v1399_v55 = vpop.permute.xlu0 %1398  ;;  %v1151_v63 = vpack.c.bf16 %v834_v38, %v832_v30  ;;  %v1153_v7 = vpack.c.bf16 %v833_v23, %v831_v28 }
 0x12c   :  { %v1406_v10 = vunpack.i.h.bf16 %v1404_v54  ;;  %v1405_v48 = vunpack.i.l.bf16 %v1404_v54  ;;  %v1401_v12 = vunpack.i.h.bf16 %v1399_v55  ;;  %v1400_v44 = vunpack.i.l.bf16 %v1399_v55 }
 0x12d   :  { %1152 = vmatprep.subr.bf16.mxu1 %v1151_v63 }
 0x12e   :  { %1154 = vmatpush1.bf16.msra.mxu1 %v1153_v7  ;;  %v388_v61 = vsel %vm197_vm6, %v1400_v44, %v1401_v12  ;;  %v390_v17 = vsel %vm197_vm6, %v1405_v48, %v1406_v10  ;;  %v387_v19 = vsel %vm197_vm6, %v1310_v22, %v1400_v44  ;;  %v389_v2 = vsel %vm197_vm6, %v1311_v62, %v1405_v48 }
 0x12f   :  { %v1414_v41 = vpop.permute.xlu1 %1413  ;;  %v1409_v29 = vpop.permute.xlu0 %1408  ;;  %v1119_v20 = vpack.c.bf16 %v390_v17, %v388_v61  ;;  %v1121_v15 = vpack.c.bf16 %v389_v2, %v387_v19 }
 0x130   :  { %v1416_v0 = vunpack.i.h.bf16 %v1414_v41  ;;  %v1415_v9 = vunpack.i.l.bf16 %v1414_v41  ;;  %v1411_v53 = vunpack.i.h.bf16 %v1409_v29  ;;  %v1410_v52 = vunpack.i.l.bf16 %v1409_v29 }
 0x131   :  { %1120 = vmatprep.subr.bf16.mxu0 %v1119_v20 }
 0x132   :  { %1122 = vmatpush1.bf16.msra.mxu0 %v1121_v15  ;;  %v874_v27 = vsel %vm197_vm6, %v1410_v52, %v1411_v53  ;;  %v876_v16 = vsel %vm197_vm6, %v1415_v9, %v1416_v0  ;;  %v873_v18 = vsel %vm197_vm6, %v1315_v45, %v1410_v52  ;;  %v875_v31 = vsel %vm197_vm6, %v1316_v25, %v1415_v9 }
 0x133   :  { %v1424_v24 = vpop.permute.xlu1 %1423  ;;  %v1419_v21 = vpop.permute.xlu0 %1418  ;;  %1124 = vmatprep.subr.bf16.mxu0 %v1123_v39  ;;  %v1155_v34 = vpack.c.bf16 %v876_v16, %v874_v27  ;;  %v1157_v14 = vpack.c.bf16 %v875_v31, %v873_v18 }
 0x134   :  { %v1426_v59 = vunpack.i.h.bf16 %v1424_v24  ;;  %v1425_v13 = vunpack.i.l.bf16 %v1424_v24  ;;  %v1421_v58 = vunpack.i.h.bf16 %v1419_v21  ;;  %v1420_v4 = vunpack.i.l.bf16 %v1419_v21 }
 0x135   :  { %1156 = vmatprep.subr.bf16.mxu1 %v1155_v34 }
 0x136   :  { %1126 = vmatpush1.bf16.msra.mxu0 %v1125_v43  ;;  %1158 = vmatpush1.bf16.msra.mxu1 %v1157_v14  ;;  %v475_v6 = vsel %vm106_vm5, %v1420_v4, %v1421_v58  ;;  %v477_v33 = vsel %vm106_vm5, %v1425_v13, %v1426_v59 }
 0x137   :  { %v1439_v35 = vpop.permute.xlu1 %1438  ;;  %v1429_v60 = vpop.permute.xlu0 %1428  ;;  %1160 = vmatprep.subr.bf16.mxu1 %v1159_v56  ;;  %v1127_v36 = vpack.c.bf16 %v477_v33, %v475_v6 }
 0x138   :  { %v1441_v37 = vunpack.i.h.bf16 %v1439_v35  ;;  %v1440_v39 = vunpack.i.l.bf16 %v1439_v35  ;;  %v1431_v26 = vunpack.i.h.bf16 %v1429_v60  ;;  %v1430_v51 = vunpack.i.l.bf16 %v1429_v60 }
 0x139   :  { %1128 = vmatprep.subr.bf16.mxu0 %v1127_v36 }
 0x13a   :  { %1162 = vmatpush1.bf16.msra.mxu1 %v1161_v57  ;;  %v952_v40 = vsel %vm106_vm5, %v1430_v51, %v1431_v26  ;;  %v954_v42 = vsel %vm106_vm5, %v1440_v39, %v1441_v37 }
 0x13b   :  { %v1444_v43 = vpop.permute.xlu1 %1443  ;;  %v1434_v1 = vpop.permute.xlu0 %1433  ;;  %v1163_v5 = vpack.c.bf16 %v954_v42, %v952_v40 }
 0x13c   :  { %v1446_v8 = vunpack.i.h.bf16 %v1444_v43  ;;  %v1445_v46 = vunpack.i.l.bf16 %v1444_v43  ;;  %v1436_v47 = vunpack.i.h.bf16 %v1434_v1  ;;  %v1435_v56 = vunpack.i.l.bf16 %v1434_v1 }
 0x13d   :  { %1164 = vmatprep.subr.bf16.mxu1 %v1163_v5 }
 0x13e   :  { %v474_v32 = vsel %vm106_vm5, %v1435_v56, %v1420_v4  ;;  %v476_v30 = vsel %vm106_vm5, %v1436_v47, %v1425_v13  ;;  %v951_v38 = vsel %vm106_vm5, %v1445_v46, %v1430_v51  ;;  %v953_v49 = vsel %vm106_vm5, %v1446_v8, %v1440_v39 }
 0x13f   :  { %v1129_v50 = vpack.c.bf16 %v476_v30, %v474_v32  ;;  %v1165_v57 = vpack.c.bf16 %v953_v49, %v951_v38 }
 0x141   :  { %1130 = vmatpush1.bf16.msra.mxu0 %v1129_v50  ;;  %1166 = vmatpush1.bf16.msra.mxu1 %v1165_v57 }
 0x144   :  { %595 = vmatmul.mubr.f32.vlgmr.msra.gmra.mrb[0].mxu0 %v1749_v11  ;;  %1067 = vmatmul.mubr.f32.vlgmr.msra.gmra.mrb[0].mxu1 %v1751_v3 }
 0x14c   :  { %v525_v28 = vpop.permute.xlu0 %524 }
 0x217   :  { %v596_v23 = vpop.f32.mrb[0].mxu0  ;;  %v1068_v62 = vpop.f32.mrb[0].mxu1 }
 0x218   :  { %v597_v22 = vadd.f32 %v596_v23, %v525_v28  ;;  %v1069_v54 = vadd.f32 %v1068_v62, %v525_v28  ;;  %v598_v55 = vpop.f32.mrb[1].mxu0  ;;  %v1070_v63 = vpop.f32.mrb[1].mxu1 }
 0x219   :  { %v599_v7 = vadd.f32 %v598_v55, %v525_v28  ;;  %v1071_v10 = vadd.f32 %v1070_v63, %v525_v28 }
 0x21a   :  { %v601_v48 = vmax.f32 %v597_v22, 0.0  ;;  %v1073_v12 = vmax.f32 %v1069_v54, 0.0 }
 0x21b   :  { %v602_v44 = vmax.f32 %v599_v7, 0.0  ;;  %v1074_v61 = vmax.f32 %v1071_v10, 0.0 }
 0x21c   :  { %603 = vst [vmem:[%s1898_s4] sm:$0xff] %v601_v48  ;;  %1093 = vst [vmem:[%s1898_s4 + $0x10] sm:$0xff] %v1073_v12 }
 0x21d   :  { %604 = vst [vmem:[%s1898_s4 + $0x8] sm:$0xff] %v602_v44  ;;  %1094 = vst [vmem:[%s1898_s4 + $0x18] sm:$0xff] %v1074_v61 }

</bundles_post_ra>
